<compile_context>
chip_gen: v7x
topology: tpu7x:2x2x1
jax: 0.10.0
libtpu: 0.0.40
codegen_flags: <defaults>
</compile_context>

<pallas_src>
import numpy as np
import jax
import jax.numpy as jnp
from jax.experimental import pallas as pl
from jax.experimental.pallas import tpu as pltpu


# ----------------------------------------------------------------------------
# Host-side precompute of the bloom table (torch buffer `token_bloom_masks`).
# ----------------------------------------------------------------------------
def _minhash_bloom_table(vocab_size: int, bloom_filter_size: int,
                         minhash_permutations: int) -> np.ndarray:
    """Deterministic stand-in for the mmh3-based precomputation.

    Same structure as the torch buffer: for each (token_id, seed) one position
    in [0, bloom_filter_size) is set to 1.
    """
    # TODO(synk): original uses mmh3.hash(f"{token_id}_{seed}"); a deterministic
    # integer mix is used here so the script has no mmh3 dependency.
    tok = np.arange(vocab_size, dtype=np.uint64)[:, None]          # [V, 1]
    seed = np.arange(minhash_permutations, dtype=np.uint64)[None]  # [1, P]
    h = (tok * np.uint64(1000003) + seed * np.uint64(999979) + np.uint64(12345))
    h = (h * np.uint64(2654435761)) % np.uint64(bloom_filter_size)  # [V, P]
    table = np.zeros((vocab_size, bloom_filter_size), dtype=np.float32)
    rows = np.repeat(np.arange(vocab_size), minhash_permutations)
    table[rows, h.reshape(-1).astype(np.int64)] = 1.0
    return table


def precompute_fused_table(table: jax.Array, w: jax.Array, b: jax.Array) -> jax.Array:
    """fused[V, D] = table @ W + b  (one-time XLA op; W is [F, D] = torch W^T)."""
    return (jnp.dot(table, w, precision=jax.lax.Precision.HIGHEST,
                    preferred_element_type=jnp.float32) + b[None, :])


# ----------------------------------------------------------------------------
# Pallas kernel: chunked, double-buffered HBM row gather (DMA) + LayerNorm.
# ----------------------------------------------------------------------------
def _gather_ln_kernel(ids_ref,      # [N_pad] int32, SMEM (scalar prefetch)
                      fused_hbm,    # [V, D]  f32, HBM (memory_space=pl.ANY)
                      gamma_ref,    # [1, D]  f32, VMEM
                      beta_ref,     # [1, D]  f32, VMEM
                      out_ref,      # [tile, D] f32, VMEM
                      gbuf,         # [2, chunk, D] f32, VMEM gather buffers
                      sem):         # DMA semaphores, shape (2,)
    tile, d = out_ref.shape
    _, chunk, _ = gbuf.shape
    vocab = fused_hbm.shape[0]
    n_chunks = tile // chunk                       # static python int
    base = pl.program_id(0) * tile

    UNROLL = 8                                     # chunk is a multiple of 8

    def issue(chunk_idx, slot):
        """Issue one row-DMA per token of chunk `chunk_idx` into gbuf[slot]."""
        row0 = chunk_idx * chunk                   # static python int

        @pl.loop(0, chunk // UNROLL)
        def _issue(g):
            r0 = g * UNROLL
            for u in range(UNROLL):                # static unroll: interleave
                r = r0 + u                         # sld / clip / desc pushes
                tok = jnp.clip(ids_ref[base + row0 + r], 0, vocab - 1)
                pltpu.make_async_copy(fused_hbm.at[tok],
                                      gbuf.at[slot, r],
                                      sem.at[slot]).start()

    # Warm-up: first chunk of this tile.
    issue(0, 0)

    for c in range(n_chunks):                      # static python loop (<= 4)
        slot = c & 1
        # Prefetch next chunk into the other slot before waiting on this one,
        # so its HBM latency overlaps the wait + LayerNorm + store below.
        if c + 1 < n_chunks:
            issue(c + 1, 1 - slot)

        # Aggregated wait: the `chunk` row copies each signal sem[slot] with
        # D*4 bytes; one descriptor sized to the whole chunk buffer drains
        # exactly that total (byte-counted DMA semaphores).
        pltpu.make_async_copy(gbuf.at[slot], gbuf.at[slot], sem.at[slot]).wait()

        # Bias already folded into the fused table; dropout is identity (eval).
        h = gbuf[slot]                             # [chunk, D] f32
        # Two-pass LayerNorm statistics (eps matches torch default 1e-5).
        mean = jnp.mean(h, axis=-1, keepdims=True)
        centered = h - mean
        var = jnp.mean(centered * centered, axis=-1, keepdims=True)
        normed = centered * jax.lax.rsqrt(var + 1e-5)
        out_ref[pl.ds(c * chunk, chunk), :] = (
            normed * gamma_ref[...] + beta_ref[...])


def _round_up(x: int, m: int) -> int:
    return (x + m - 1) // m * m


def tokenized_minhash_projection(input_ids, fused_table, ln_gamma, ln_beta,
                                 *, token_tile: int = 512,
                                 row_chunk: int = 128):
    """input_ids: [B, S] int -> [B, S, D] f32.

    fused_table: [V, D] = token_bloom_masks @ W^T + b (precomputed, lives in HBM).
    """
    B, S = input_ids.shape
    V, D = fused_table.shape
    N = B * S

    tile = min(token_tile, _round_up(N, 8))        # (8,128) sublane constraint
    chunk = min(row_chunk, tile)                   # multiple of 8 by construction
    tile = _round_up(tile, chunk)                  # tile must divide into chunks
    n_pad = _round_up(N, tile)
    # Padded ids are 0: their rows are gathered/normalized then discarded.
    # TODO(synk): guard the final tile's issue loop with `base + r < N` (and
    # matching per-row waits) if padded-row waste ever matters.
    ids = jnp.zeros((n_pad,), jnp.int32).at[:N].set(
        input_ids.reshape(-1).astype(jnp.int32))

    grid = (n_pad // tile,)
    out = pl.pallas_call(
        _gather_ln_kernel,
        out_shape=jax.ShapeDtypeStruct((n_pad, D), jnp.float32),
        grid_spec=pltpu.PrefetchScalarGridSpec(
            num_scalar_prefetch=1,                       # ids -> SMEM
            grid=grid,
            in_specs=[
                pl.BlockSpec(memory_space=pl.ANY),       # fused table stays in HBM
                pl.BlockSpec((1, D), lambda i, ids: (0, 0)),   # LN gamma
                pl.BlockSpec((1, D), lambda i, ids: (0, 0)),   # LN beta
            ],
            out_specs=pl.BlockSpec((tile, D), lambda i, ids: (i, 0)),
            scratch_shapes=[
                pltpu.VMEM((2, chunk, D), jnp.float32),  # double-buffered gather
                pltpu.SemaphoreType.DMA((2,)),           # one DMA sem per slot
            ],
        ),
        compiler_params=pltpu.CompilerParams(
            dimension_semantics=("parallel",),           # steps self-contained
            vmem_limit_bytes=32 * 1024 * 1024),
        cost_estimate=pl.CostEstimate(
            flops=10 * n_pad * D,                        # LayerNorm VPU work
            transcendentals=n_pad,                       # rsqrt per row
            bytes_accessed=2 * n_pad * D * 4 + n_pad * 4),
    )(ids, fused_table, ln_gamma.reshape(1, D), ln_beta.reshape(1, D))

    return out[:N].reshape(B, S, D)


# ----------------------------------------------------------------------------
# Demo / correctness check.
# ----------------------------------------------------------------------------
if __name__ == "__main__":
    # Full module configuration (the HBM-gather design scales to the real vocab).
    output_dim = 256
    minhash_permutations = 128
    bloom_filter_size = 512
    vocab_size = 30000
    batch_size, seq_length = 2, 8

    table_np = _minhash_bloom_table(vocab_size, bloom_filter_size,
                                    minhash_permutations)
    table = jnp.asarray(table_np)                      # [V, F]

    key = jax.random.PRNGKey(0)
    k_w, k_b, k_ids = jax.random.split(key, 3)
    # nn.Linear(bloom_filter_size, output_dim): torch weight is [D, F];
    # we generate W already transposed to [F, D].
    bound = 1.0 / np.sqrt(bloom_filter_size)
    w = jax.random.uniform(k_w, (bloom_filter_size, output_dim),
                           jnp.float32, -bound, bound)
    b = jax.random.uniform(k_b, (output_dim,), jnp.float32, -bound, bound)
    gamma = jnp.ones((output_dim,), jnp.float32)
    beta = jnp.zeros((output_dim,), jnp.float32)

    input_ids = jax.random.randint(k_ids, (batch_size, seq_length),
                                   0, vocab_size, dtype=jnp.int32)

    # One-time algebraic fusion (gather + Linear collapse into one HBM table).
    fused = precompute_fused_table(table, w, b)        # [V, D]

    out = tokenized_minhash_projection(input_ids, fused, gamma, beta)
    out = jax.block_until_ready(out)

    # Reference: exact module semantics (gather -> Linear -> dropout(eval) -> LN).
    bloom_ref = table[input_ids]                                  # [B, S, F]
    h_ref = jnp.dot(bloom_ref, w,
                    precision=jax.lax.Precision.HIGHEST) + b      # [B, S, D]
    mean = h_ref.mean(-1, keepdims=True)
    var = ((h_ref - mean) ** 2).mean(-1, keepdims=True)
    ref = (h_ref - mean) * jax.lax.rsqrt(var + 1e-5) * gamma + beta
    np.testing.assert_allclose(np.asarray(out), np.asarray(ref),
                               rtol=2e-4, atol=2e-4)

    assert out.shape == (batch_size, seq_length, output_dim)
    print("KERNEL_OK")
</pallas_src>

<mosaic_0001>
module attributes {stable_mosaic.version = 11 : i64} {
  func.func @_gather_ln_kernel(%arg0: i32, %arg1: memref<16xi32, #tpu.memory_space<smem>>, %arg2: memref<30000x256xf32, #tpu.memory_space<any>>, %arg3: memref<1x256xf32, #tpu.memory_space<vmem>>, %arg4: memref<1x256xf32, #tpu.memory_space<vmem>>, %arg5: memref<16x256xf32, #tpu.memory_space<vmem>>, %arg6: memref<2x16x256xf32, #tpu.memory_space<vmem>>, %arg7: memref<2x!tpu.dma_semaphore, #tpu.memory_space<semaphore_mem>>) attributes {dimension_semantics = [#tpu.dimension_semantics<parallel>], iteration_bounds = array<i64: 1>, scalar_prefetch = 1 : i64, scratch_operands = 2 : i64, tpu.core_type = #tpu.core_type<tc>, window_params = [{}, {pipeline_mode = #tpu.pipeline_mode<synchronous>, transform_indices = @transform_1, window_bounds = array<i64: 1, 256>}, {pipeline_mode = #tpu.pipeline_mode<synchronous>, transform_indices = @transform_2, window_bounds = array<i64: 1, 256>}, {transform_indices = @transform_3, window_bounds = array<i64: 16, 256>}]} {
    %c16_i32 = arith.constant 16 : i32
    %0 = arith.muli %arg0, %c16_i32 : i32
    %c0_i32 = arith.constant 0 : i32
    %c2_i32 = arith.constant 2 : i32
    %1 = arith.addi %c0_i32, %c2_i32 : i32
    %c1_i32 = arith.constant 1 : i32
    scf.for %arg8 = %c0_i32 to %1 step %c1_i32  : i32 {
      %c1_i32_20 = arith.constant 1 : i32
      %33 = arith.muli %arg8, %c1_i32_20 : i32
      %c0_i32_21 = arith.constant 0 : i32
      %34 = arith.addi %c0_i32_21, %33 : i32
      %c8_i32 = arith.constant 8 : i32
      %35 = arith.muli %34, %c8_i32 : i32
      %c0_i32_22 = arith.constant 0 : i32
      %36 = arith.addi %35, %c0_i32_22 : i32
      %c0_i32_23 = arith.constant 0 : i32
      %37 = arith.addi %0, %c0_i32_23 : i32
      %38 = arith.addi %37, %36 : i32
      %39 = arith.index_cast %38 : i32 to index
      %40 = memref.load %arg1[%39] : memref<16xi32, #tpu.memory_space<smem>>
      %c0_i32_24 = arith.constant 0 : i32
      %c29999_i32 = arith.constant 29999 : i32
      %41 = arith.maxsi %c0_i32_24, %40 : i32
      %42 = arith.minsi %c29999_i32, %41 : i32
      %c0_i32_25 = arith.constant 0 : i32
      %c0_i32_26 = arith.constant 0 : i32
      %c0_i32_27 = arith.constant 0 : i32
      %43 = tpu.memref_slice %arg2[%42, %c0_i32_27] : memref<30000x256xf32, #tpu.memory_space<any>> -> memref<1x256xf32, #tpu.memory_space<any>>
      %44 = tpu.memref_squeeze %43 : memref<1x256xf32, #tpu.memory_space<any>> -> memref<256xf32, #tpu.memory_space<any>>
      %c0_i32_28 = arith.constant 0 : i32
      %45 = tpu.memref_slice %arg6[%c0_i32_25, %36, %c0_i32_28] : memref<2x16x256xf32, #tpu.memory_space<vmem>> -> memref<1x1x256xf32, #tpu.memory_space<vmem>>
      %46 = tpu.memref_squeeze %45 : memref<1x1x256xf32, #tpu.memory_space<vmem>> -> memref<256xf32, #tpu.memory_space<vmem>>
      %47 = tpu.memref_slice %arg7[%c0_i32_26] : memref<2x!tpu.dma_semaphore, #tpu.memory_space<semaphore_mem>> -> memref<1x!tpu.dma_semaphore, #tpu.memory_space<semaphore_mem>>
      %48 = tpu.memref_squeeze %47 : memref<1x!tpu.dma_semaphore, #tpu.memory_space<semaphore_mem>> -> memref<!tpu.dma_semaphore, #tpu.memory_space<semaphore_mem>>
      tpu.enqueue_dma source(%44 : memref<256xf32, #tpu.memory_space<any>>) target(%46 : memref<256xf32, #tpu.memory_space<vmem>>) target_semaphore(%48 : memref<!tpu.dma_semaphore, #tpu.memory_space<semaphore_mem>>)
      %c1_i32_29 = arith.constant 1 : i32
      %49 = arith.addi %35, %c1_i32_29 : i32
      %c0_i32_30 = arith.constant 0 : i32
      %50 = arith.addi %0, %c0_i32_30 : i32
      %51 = arith.addi %50, %49 : i32
      %52 = arith.index_cast %51 : i32 to index
      %53 = memref.load %arg1[%52] : memref<16xi32, #tpu.memory_space<smem>>
      %c0_i32_31 = arith.constant 0 : i32
      %c29999_i32_32 = arith.constant 29999 : i32
      %54 = arith.maxsi %c0_i32_31, %53 : i32
      %55 = arith.minsi %c29999_i32_32, %54 : i32
      %c0_i32_33 = arith.constant 0 : i32
      %c0_i32_34 = arith.constant 0 : i32
      %c0_i32_35 = arith.constant 0 : i32
      %56 = tpu.memref_slice %arg2[%55, %c0_i32_35] : memref<30000x256xf32, #tpu.memory_space<any>> -> memref<1x256xf32, #tpu.memory_space<any>>
      %57 = tpu.memref_squeeze %56 : memref<1x256xf32, #tpu.memory_space<any>> -> memref<256xf32, #tpu.memory_space<any>>
      %c0_i32_36 = arith.constant 0 : i32
      %58 = tpu.memref_slice %arg6[%c0_i32_33, %49, %c0_i32_36] : memref<2x16x256xf32, #tpu.memory_space<vmem>> -> memref<1x1x256xf32, #tpu.memory_space<vmem>>
      %59 = tpu.memref_squeeze %58 : memref<1x1x256xf32, #tpu.memory_space<vmem>> -> memref<256xf32, #tpu.memory_space<vmem>>
      %60 = tpu.memref_slice %arg7[%c0_i32_34] : memref<2x!tpu.dma_semaphore, #tpu.memory_space<semaphore_mem>> -> memref<1x!tpu.dma_semaphore, #tpu.memory_space<semaphore_mem>>
      %61 = tpu.memref_squeeze %60 : memref<1x!tpu.dma_semaphore, #tpu.memory_space<semaphore_mem>> -> memref<!tpu.dma_semaphore, #tpu.memory_space<semaphore_mem>>
      tpu.enqueue_dma source(%57 : memref<256xf32, #tpu.memory_space<any>>) target(%59 : memref<256xf32, #tpu.memory_space<vmem>>) target_semaphore(%61 : memref<!tpu.dma_semaphore, #tpu.memory_space<semaphore_mem>>)
      %c2_i32_37 = arith.constant 2 : i32
      %62 = arith.addi %35, %c2_i32_37 : i32
      %c0_i32_38 = arith.constant 0 : i32
      %63 = arith.addi %0, %c0_i32_38 : i32
      %64 = arith.addi %63, %62 : i32
      %65 = arith.index_cast %64 : i32 to index
      %66 = memref.load %arg1[%65] : memref<16xi32, #tpu.memory_space<smem>>
      %c0_i32_39 = arith.constant 0 : i32
      %c29999_i32_40 = arith.constant 29999 : i32
      %67 = arith.maxsi %c0_i32_39, %66 : i32
      %68 = arith.minsi %c29999_i32_40, %67 : i32
      %c0_i32_41 = arith.constant 0 : i32
      %c0_i32_42 = arith.constant 0 : i32
      %c0_i32_43 = arith.constant 0 : i32
      %69 = tpu.memref_slice %arg2[%68, %c0_i32_43] : memref<30000x256xf32, #tpu.memory_space<any>> -> memref<1x256xf32, #tpu.memory_space<any>>
      %70 = tpu.memref_squeeze %69 : memref<1x256xf32, #tpu.memory_space<any>> -> memref<256xf32, #tpu.memory_space<any>>
      %c0_i32_44 = arith.constant 0 : i32
      %71 = tpu.memref_slice %arg6[%c0_i32_41, %62, %c0_i32_44] : memref<2x16x256xf32, #tpu.memory_space<vmem>> -> memref<1x1x256xf32, #tpu.memory_space<vmem>>
      %72 = tpu.memref_squeeze %71 : memref<1x1x256xf32, #tpu.memory_space<vmem>> -> memref<256xf32, #tpu.memory_space<vmem>>
      %73 = tpu.memref_slice %arg7[%c0_i32_42] : memref<2x!tpu.dma_semaphore, #tpu.memory_space<semaphore_mem>> -> memref<1x!tpu.dma_semaphore, #tpu.memory_space<semaphore_mem>>
      %74 = tpu.memref_squeeze %73 : memref<1x!tpu.dma_semaphore, #tpu.memory_space<semaphore_mem>> -> memref<!tpu.dma_semaphore, #tpu.memory_space<semaphore_mem>>
      tpu.enqueue_dma source(%70 : memref<256xf32, #tpu.memory_space<any>>) target(%72 : memref<256xf32, #tpu.memory_space<vmem>>) target_semaphore(%74 : memref<!tpu.dma_semaphore, #tpu.memory_space<semaphore_mem>>)
      %c3_i32 = arith.constant 3 : i32
      %75 = arith.addi %35, %c3_i32 : i32
      %c0_i32_45 = arith.constant 0 : i32
      %76 = arith.addi %0, %c0_i32_45 : i32
      %77 = arith.addi %76, %75 : i32
      %78 = arith.index_cast %77 : i32 to index
      %79 = memref.load %arg1[%78] : memref<16xi32, #tpu.memory_space<smem>>
      %c0_i32_46 = arith.constant 0 : i32
      %c29999_i32_47 = arith.constant 29999 : i32
      %80 = arith.maxsi %c0_i32_46, %79 : i32
      %81 = arith.minsi %c29999_i32_47, %80 : i32
      %c0_i32_48 = arith.constant 0 : i32
      %c0_i32_49 = arith.constant 0 : i32
      %c0_i32_50 = arith.constant 0 : i32
      %82 = tpu.memref_slice %arg2[%81, %c0_i32_50] : memref<30000x256xf32, #tpu.memory_space<any>> -> memref<1x256xf32, #tpu.memory_space<any>>
      %83 = tpu.memref_squeeze %82 : memref<1x256xf32, #tpu.memory_space<any>> -> memref<256xf32, #tpu.memory_space<any>>
      %c0_i32_51 = arith.constant 0 : i32
      %84 = tpu.memref_slice %arg6[%c0_i32_48, %75, %c0_i32_51] : memref<2x16x256xf32, #tpu.memory_space<vmem>> -> memref<1x1x256xf32, #tpu.memory_space<vmem>>
      %85 = tpu.memref_squeeze %84 : memref<1x1x256xf32, #tpu.memory_space<vmem>> -> memref<256xf32, #tpu.memory_space<vmem>>
      %86 = tpu.memref_slice %arg7[%c0_i32_49] : memref<2x!tpu.dma_semaphore, #tpu.memory_space<semaphore_mem>> -> memref<1x!tpu.dma_semaphore, #tpu.memory_space<semaphore_mem>>
      %87 = tpu.memref_squeeze %86 : memref<1x!tpu.dma_semaphore, #tpu.memory_space<semaphore_mem>> -> memref<!tpu.dma_semaphore, #tpu.memory_space<semaphore_mem>>
      tpu.enqueue_dma source(%83 : memref<256xf32, #tpu.memory_space<any>>) target(%85 : memref<256xf32, #tpu.memory_space<vmem>>) target_semaphore(%87 : memref<!tpu.dma_semaphore, #tpu.memory_space<semaphore_mem>>)
      %c4_i32 = arith.constant 4 : i32
      %88 = arith.addi %35, %c4_i32 : i32
      %c0_i32_52 = arith.constant 0 : i32
      %89 = arith.addi %0, %c0_i32_52 : i32
      %90 = arith.addi %89, %88 : i32
      %91 = arith.index_cast %90 : i32 to index
      %92 = memref.load %arg1[%91] : memref<16xi32, #tpu.memory_space<smem>>
      %c0_i32_53 = arith.constant 0 : i32
      %c29999_i32_54 = arith.constant 29999 : i32
      %93 = arith.maxsi %c0_i32_53, %92 : i32
      %94 = arith.minsi %c29999_i32_54, %93 : i32
      %c0_i32_55 = arith.constant 0 : i32
      %c0_i32_56 = arith.constant 0 : i32
      %c0_i32_57 = arith.constant 0 : i32
      %95 = tpu.memref_slice %arg2[%94, %c0_i32_57] : memref<30000x256xf32, #tpu.memory_space<any>> -> memref<1x256xf32, #tpu.memory_space<any>>
      %96 = tpu.memref_squeeze %95 : memref<1x256xf32, #tpu.memory_space<any>> -> memref<256xf32, #tpu.memory_space<any>>
      %c0_i32_58 = arith.constant 0 : i32
      %97 = tpu.memref_slice %arg6[%c0_i32_55, %88, %c0_i32_58] : memref<2x16x256xf32, #tpu.memory_space<vmem>> -> memref<1x1x256xf32, #tpu.memory_space<vmem>>
      %98 = tpu.memref_squeeze %97 : memref<1x1x256xf32, #tpu.memory_space<vmem>> -> memref<256xf32, #tpu.memory_space<vmem>>
      %99 = tpu.memref_slice %arg7[%c0_i32_56] : memref<2x!tpu.dma_semaphore, #tpu.memory_space<semaphore_mem>> -> memref<1x!tpu.dma_semaphore, #tpu.memory_space<semaphore_mem>>
      %100 = tpu.memref_squeeze %99 : memref<1x!tpu.dma_semaphore, #tpu.memory_space<semaphore_mem>> -> memref<!tpu.dma_semaphore, #tpu.memory_space<semaphore_mem>>
      tpu.enqueue_dma source(%96 : memref<256xf32, #tpu.memory_space<any>>) target(%98 : memref<256xf32, #tpu.memory_space<vmem>>) target_semaphore(%100 : memref<!tpu.dma_semaphore, #tpu.memory_space<semaphore_mem>>)
      %c5_i32 = arith.constant 5 : i32
      %101 = arith.addi %35, %c5_i32 : i32
      %c0_i32_59 = arith.constant 0 : i32
      %102 = arith.addi %0, %c0_i32_59 : i32
      %103 = arith.addi %102, %101 : i32
      %104 = arith.index_cast %103 : i32 to index
      %105 = memref.load %arg1[%104] : memref<16xi32, #tpu.memory_space<smem>>
      %c0_i32_60 = arith.constant 0 : i32
      %c29999_i32_61 = arith.constant 29999 : i32
      %106 = arith.maxsi %c0_i32_60, %105 : i32
      %107 = arith.minsi %c29999_i32_61, %106 : i32
      %c0_i32_62 = arith.constant 0 : i32
      %c0_i32_63 = arith.constant 0 : i32
      %c0_i32_64 = arith.constant 0 : i32
      %108 = tpu.memref_slice %arg2[%107, %c0_i32_64] : memref<30000x256xf32, #tpu.memory_space<any>> -> memref<1x256xf32, #tpu.memory_space<any>>
      %109 = tpu.memref_squeeze %108 : memref<1x256xf32, #tpu.memory_space<any>> -> memref<256xf32, #tpu.memory_space<any>>
      %c0_i32_65 = arith.constant 0 : i32
      %110 = tpu.memref_slice %arg6[%c0_i32_62, %101, %c0_i32_65] : memref<2x16x256xf32, #tpu.memory_space<vmem>> -> memref<1x1x256xf32, #tpu.memory_space<vmem>>
      %111 = tpu.memref_squeeze %110 : memref<1x1x256xf32, #tpu.memory_space<vmem>> -> memref<256xf32, #tpu.memory_space<vmem>>
      %112 = tpu.memref_slice %arg7[%c0_i32_63] : memref<2x!tpu.dma_semaphore, #tpu.memory_space<semaphore_mem>> -> memref<1x!tpu.dma_semaphore, #tpu.memory_space<semaphore_mem>>
      %113 = tpu.memref_squeeze %112 : memref<1x!tpu.dma_semaphore, #tpu.memory_space<semaphore_mem>> -> memref<!tpu.dma_semaphore, #tpu.memory_space<semaphore_mem>>
      tpu.enqueue_dma source(%109 : memref<256xf32, #tpu.memory_space<any>>) target(%111 : memref<256xf32, #tpu.memory_space<vmem>>) target_semaphore(%113 : memref<!tpu.dma_semaphore, #tpu.memory_space<semaphore_mem>>)
      %c6_i32 = arith.constant 6 : i32
      %114 = arith.addi %35, %c6_i32 : i32
      %c0_i32_66 = arith.constant 0 : i32
      %115 = arith.addi %0, %c0_i32_66 : i32
      %116 = arith.addi %115, %114 : i32
      %117 = arith.index_cast %116 : i32 to index
      %118 = memref.load %arg1[%117] : memref<16xi32, #tpu.memory_space<smem>>
      %c0_i32_67 = arith.constant 0 : i32
      %c29999_i32_68 = arith.constant 29999 : i32
      %119 = arith.maxsi %c0_i32_67, %118 : i32
      %120 = arith.minsi %c29999_i32_68, %119 : i32
      %c0_i32_69 = arith.constant 0 : i32
      %c0_i32_70 = arith.constant 0 : i32
      %c0_i32_71 = arith.constant 0 : i32
      %121 = tpu.memref_slice %arg2[%120, %c0_i32_71] : memref<30000x256xf32, #tpu.memory_space<any>> -> memref<1x256xf32, #tpu.memory_space<any>>
      %122 = tpu.memref_squeeze %121 : memref<1x256xf32, #tpu.memory_space<any>> -> memref<256xf32, #tpu.memory_space<any>>
      %c0_i32_72 = arith.constant 0 : i32
      %123 = tpu.memref_slice %arg6[%c0_i32_69, %114, %c0_i32_72] : memref<2x16x256xf32, #tpu.memory_space<vmem>> -> memref<1x1x256xf32, #tpu.memory_space<vmem>>
      %124 = tpu.memref_squeeze %123 : memref<1x1x256xf32, #tpu.memory_space<vmem>> -> memref<256xf32, #tpu.memory_space<vmem>>
      %125 = tpu.memref_slice %arg7[%c0_i32_70] : memref<2x!tpu.dma_semaphore, #tpu.memory_space<semaphore_mem>> -> memref<1x!tpu.dma_semaphore, #tpu.memory_space<semaphore_mem>>
      %126 = tpu.memref_squeeze %125 : memref<1x!tpu.dma_semaphore, #tpu.memory_space<semaphore_mem>> -> memref<!tpu.dma_semaphore, #tpu.memory_space<semaphore_mem>>
      tpu.enqueue_dma source(%122 : memref<256xf32, #tpu.memory_space<any>>) target(%124 : memref<256xf32, #tpu.memory_space<vmem>>) target_semaphore(%126 : memref<!tpu.dma_semaphore, #tpu.memory_space<semaphore_mem>>)
      %c7_i32 = arith.constant 7 : i32
      %127 = arith.addi %35, %c7_i32 : i32
      %c0_i32_73 = arith.constant 0 : i32
      %128 = arith.addi %0, %c0_i32_73 : i32
      %129 = arith.addi %128, %127 : i32
      %130 = arith.index_cast %129 : i32 to index
      %131 = memref.load %arg1[%130] : memref<16xi32, #tpu.memory_space<smem>>
      %c0_i32_74 = arith.constant 0 : i32
      %c29999_i32_75 = arith.constant 29999 : i32
      %132 = arith.maxsi %c0_i32_74, %131 : i32
      %133 = arith.minsi %c29999_i32_75, %132 : i32
      %c0_i32_76 = arith.constant 0 : i32
      %c0_i32_77 = arith.constant 0 : i32
      %c0_i32_78 = arith.constant 0 : i32
      %134 = tpu.memref_slice %arg2[%133, %c0_i32_78] : memref<30000x256xf32, #tpu.memory_space<any>> -> memref<1x256xf32, #tpu.memory_space<any>>
      %135 = tpu.memref_squeeze %134 : memref<1x256xf32, #tpu.memory_space<any>> -> memref<256xf32, #tpu.memory_space<any>>
      %c0_i32_79 = arith.constant 0 : i32
      %136 = tpu.memref_slice %arg6[%c0_i32_76, %127, %c0_i32_79] : memref<2x16x256xf32, #tpu.memory_space<vmem>> -> memref<1x1x256xf32, #tpu.memory_space<vmem>>
      %137 = tpu.memref_squeeze %136 : memref<1x1x256xf32, #tpu.memory_space<vmem>> -> memref<256xf32, #tpu.memory_space<vmem>>
      %138 = tpu.memref_slice %arg7[%c0_i32_77] : memref<2x!tpu.dma_semaphore, #tpu.memory_space<semaphore_mem>> -> memref<1x!tpu.dma_semaphore, #tpu.memory_space<semaphore_mem>>
      %139 = tpu.memref_squeeze %138 : memref<1x!tpu.dma_semaphore, #tpu.memory_space<semaphore_mem>> -> memref<!tpu.dma_semaphore, #tpu.memory_space<semaphore_mem>>
      tpu.enqueue_dma source(%135 : memref<256xf32, #tpu.memory_space<any>>) target(%137 : memref<256xf32, #tpu.memory_space<vmem>>) target_semaphore(%139 : memref<!tpu.dma_semaphore, #tpu.memory_space<semaphore_mem>>)
    }
    %c2_i32_0 = arith.constant 2 : i32
    %c0_i32_1 = arith.constant 0 : i32
    %c0_i32_2 = arith.constant 0 : i32
    %c0_i32_3 = arith.constant 0 : i32
    %c0_i32_4 = arith.constant 0 : i32
    %c0_i32_5 = arith.constant 0 : i32
    %2 = tpu.memref_slice %arg6[%c0_i32_1, %c0_i32_4, %c0_i32_5] : memref<2x16x256xf32, #tpu.memory_space<vmem>> -> memref<1x16x256xf32, #tpu.memory_space<vmem>>
    %3 = tpu.memref_squeeze %2 : memref<1x16x256xf32, #tpu.memory_space<vmem>> -> memref<16x256xf32, #tpu.memory_space<vmem>>
    %c0_i32_6 = arith.constant 0 : i32
    %c0_i32_7 = arith.constant 0 : i32
    %4 = tpu.memref_slice %arg6[%c0_i32_2, %c0_i32_6, %c0_i32_7] : memref<2x16x256xf32, #tpu.memory_space<vmem>> -> memref<1x16x256xf32, #tpu.memory_space<vmem>>
    %5 = tpu.memref_squeeze %4 : memref<1x16x256xf32, #tpu.memory_space<vmem>> -> memref<16x256xf32, #tpu.memory_space<vmem>>
    %6 = tpu.memref_slice %arg7[%c0_i32_3] : memref<2x!tpu.dma_semaphore, #tpu.memory_space<semaphore_mem>> -> memref<1x!tpu.dma_semaphore, #tpu.memory_space<semaphore_mem>>
    %7 = tpu.memref_squeeze %6 : memref<1x!tpu.dma_semaphore, #tpu.memory_space<semaphore_mem>> -> memref<!tpu.dma_semaphore, #tpu.memory_space<semaphore_mem>>
    tpu.wait_dma2 semaphore(%7 : memref<!tpu.dma_semaphore, #tpu.memory_space<semaphore_mem>>) src(%3 : memref<16x256xf32, #tpu.memory_space<vmem>>) dst(%5 : memref<16x256xf32, #tpu.memory_space<vmem>>)
    %c0 = arith.constant 0 : index
    %c0_8 = arith.constant 0 : index
    %c0_9 = arith.constant 0 : index
    %8 = vector.load %arg6[%c0, %c0_8, %c0_9] : memref<2x16x256xf32, #tpu.memory_space<vmem>>, vector<1x16x256xf32>
    %9 = vector.shape_cast %8 : vector<1x16x256xf32> to vector<16x256xf32>
    %cst = arith.constant dense<0.000000e+00> : vector<16xf32>
    %10 = vector.multi_reduction <add>, %9, %cst [1] : vector<16x256xf32> to vector<16xf32>
    %11 = vector.shape_cast %10 : vector<16xf32> to vector<16x1xf32>
    %cst_10 = arith.constant 2.560000e+02 : f32
    %12 = vector.broadcast %cst_10 : f32 to vector<16x1xf32>
    %13 = arith.divf %11, %12 : vector<16x1xf32>
    %14 = vector.broadcast %13 : vector<16x1xf32> to vector<16x256xf32>
    %15 = arith.subf %9, %14 : vector<16x256xf32>
    %16 = arith.mulf %15, %15 : vector<16x256xf32>
    %cst_11 = arith.constant dense<0.000000e+00> : vector<16xf32>
    %17 = vector.multi_reduction <add>, %16, %cst_11 [1] : vector<16x256xf32> to vector<16xf32>
    %18 = vector.shape_cast %17 : vector<16xf32> to vector<16x1xf32>
    %cst_12 = arith.constant 2.560000e+02 : f32
    %19 = vector.broadcast %cst_12 : f32 to vector<16x1xf32>
    %20 = arith.divf %18, %19 : vector<16x1xf32>
    %cst_13 = arith.constant 9.99999974E-6 : f32
    %21 = vector.broadcast %cst_13 : f32 to vector<16x1xf32>
    %22 = arith.addf %20, %21 : vector<16x1xf32>
    %23 = math.rsqrt %22 : vector<16x1xf32>
    %24 = vector.broadcast %23 : vector<16x1xf32> to vector<16x256xf32>
    %25 = arith.mulf %15, %24 : vector<16x256xf32>
    %c0_14 = arith.constant 0 : index
    %c0_15 = arith.constant 0 : index
    %26 = vector.load %arg3[%c0_14, %c0_15] : memref<1x256xf32, #tpu.memory_space<vmem>>, vector<1x256xf32>
    %27 = vector.broadcast %26 : vector<1x256xf32> to vector<16x256xf32>
    %28 = arith.mulf %25, %27 : vector<16x256xf32>
    %c0_16 = arith.constant 0 : index
    %c0_17 = arith.constant 0 : index
    %29 = vector.load %arg4[%c0_16, %c0_17] : memref<1x256xf32, #tpu.memory_space<vmem>>, vector<1x256xf32>
    %30 = vector.broadcast %29 : vector<1x256xf32> to vector<16x256xf32>
    %31 = arith.addf %28, %30 : vector<16x256xf32>
    %c0_18 = arith.constant 0 : index
    %c0_19 = arith.constant 0 : index
    %32 = vector.load %arg5[%c0_18, %c0_19] : memref<16x256xf32, #tpu.memory_space<vmem>>, vector<16x256xf32>
    tpu.vector_store %arg5[%c0_18, %c0_19], %31 {strides = array<i32>} : memref<16x256xf32, #tpu.memory_space<vmem>>, vector<16x256xf32>,
    return
  }
  func.func @transform_1(%arg0: i32, %arg1: memref<16xi32, #tpu.memory_space<smem>>) -> (i32, i32) {
    %c0_i32 = arith.constant 0 : i32
    %c0_i32_0 = arith.constant 0 : i32
    %c0_i32_1 = arith.constant 0 : i32
    return %c0_i32, %c0_i32_0 : i32, i32
  }
  func.func @transform_2(%arg0: i32, %arg1: memref<16xi32, #tpu.memory_space<smem>>) -> (i32, i32) {
    %c0_i32 = arith.constant 0 : i32
    %c0_i32_0 = arith.constant 0 : i32
    %c0_i32_1 = arith.constant 0 : i32
    return %c0_i32, %c0_i32_0 : i32, i32
  }
  func.func @transform_3(%arg0: i32, %arg1: memref<16xi32, #tpu.memory_space<smem>>) -> (i32, i32) {
    %c0_i32 = arith.constant 0 : i32
    %c0_i32_0 = arith.constant 0 : i32
    return %arg0, %c0_i32 : i32, i32
  }
}

</mosaic_0001>

<bundles_post_ra>
// kernel: tpu_custom_call.1
= control target key start
LH: loop header
LB: loop body
LE: loop exit
PB: predicated region body
PF: predicated region fallthrough
CT: control target
= control target key end

     0   :  { %s1093_s0 = inlined_call_operand.hbm [shape: s32[16], index: 0, kind: input, shape index: {}]   ;;  %s1094_s1 = inlined_call_operand.hbm [shape: f32[30000,256], index: 1, kind: input, shape index: {}]   ;;  %s1095_s2 = inlined_call_operand.hbm [shape: f32[1,256], index: 2, kind: input, shape index: {}]   ;;  %s1096_s3 = inlined_call_operand.hbm [shape: f32[1,256], index: 3, kind: input, shape index: {}]   ;;  %s1097_s4 = inlined_call_operand.hbm [shape: f32[16,256], index: 4, kind: output, shape index: {}]  }
   0x1   :  { %s505_s17 = scalar_lea.hbm %s1093_s0, 16 }
   0x2   :  { %p506_p0 = scmp.ne.s32.totalorder %s1093_s0, %s505_s17  ;;  %p509_p1 = scmp.lt.u32.totalorder %s505_s17, %s1093_s0 }
   0x4   :  { %p511_p2 = pnand %p509_p1, %p506_p0 }
   0x6   :  { %514 = shalt.err (!%p511_p2)  }
   0x7   :  { %s791_s22 = smov [#allocation5]  }
   0x8   :  { %10 = dma.hbm_to_smem %s1093_s0, 16, %s791_s22, [#allocation4] }
   0x9   :  { %777 = dma.done.wait [#allocation4], 16 }
   0xa   :  { %778 = vsyncadd [#allocation4], 4294967280 }
   0xb   :  { %12 = sfence }
   0xc   :  { %13 = vsyncpa [#allocation7], 0 }
   0xd   :  { %14 = vsyncpa [#allocation10], 0 }
   0xe   :  { %15 = vsyncpa [#allocation8], 0  ;;  %s792_s25 = smov [#allocation6]   ;;  %s793_s27 = smov [#allocation9]  }
   0xf   :  { %s22_s26 = sshll.u32 %s792_s25, 4  ;;  %s32_s28 = sshll.u32 %s793_s27, 4  ;;  %s23_s26 = int_to_ptr.vmem [resolvable:$true] %s22_s26  ;;  %s33_s28 = int_to_ptr.vmem [resolvable:$true] %s32_s28 }
  0x10   :  { %s515_s5 = scalar_lea.hbm %s1095_s2, 32 }
  0x11   :  { %p516_p3 = scmp.ne.s32.totalorder %s1095_s2, %s515_s5  ;;  %p519_p4 = scmp.lt.u32.totalorder %s515_s5, %s1095_s2 }
  0x13   :  { %p521_p5 = pnand %p519_p4, %p516_p3 }
  0x15   :  { %524 = shalt.err (!%p521_p5)
}
  0x16   :  { %s525_s9 = scalar_lea.vmem %s23_s26, 32  ;;  %p530_p7 = scmp.lt.s32.totalorder %s23_s26, %s23_s26 }
  0x17   :  { %p526_p6 = scmp.ne.s32.totalorder %s23_s26, %s525_s9  ;;  %p531_p8 = scmp.lt.s32.totalorder %s525_s9, %s525_s9 }
  0x19   :  { %p532_p9 = por %p531_p8, %p530_p7 }
  0x1b   :  { %p533_p10 = pnand %p532_p9, %p526_p6 }
  0x1d   :  { %536 = shalt.err (!%p533_p10)
}
  0x1e   :  { %25 = dma.hbm_to_vmem [thread:$0]  %s1095_s2, 32, %s23_s26, [#allocation7]  }
  0x1f   :  { %s537_s14 = scalar_lea.hbm %s1096_s3, 32 }
  0x20   :  { %p538_p11 = scmp.ne.s32.totalorder %s1096_s3, %s537_s14  ;;  %p541_p12 = scmp.lt.u32.totalorder %s537_s14, %s1096_s3 }
  0x22   :  { %p543_p13 = pnand %p541_p12, %p538_p11 }
  0x24   :  { %546 = shalt.err (!%p543_p13)
}
  0x25   :  { %s547_s19 = scalar_lea.vmem %s33_s28, 32  ;;  %p552_p1 = scmp.lt.s32.totalorder %s33_s28, %s33_s28 }
  0x26   :  { %p548_p0 = scmp.ne.s32.totalorder %s33_s28, %s547_s19  ;;  %p553_p2 = scmp.lt.s32.totalorder %s547_s19, %s547_s19 }
  0x28   :  { %p554_p3 = por %p553_p2, %p552_p1 }
  0x2a   :  { %p555_p4 = pnand %p554_p3, %p548_p0 }
  0x2c   :  { %558 = shalt.err (!%p555_p4)
}
  0x2d   :  { %35 = dma.hbm_to_vmem [thread:$0]  %s1096_s3, 32, %s33_s28, [#allocation10]  }
  0x2e   :  { %779 = dma.done.wait [#allocation7], 32  }
  0x2f   :  { %780 = vsyncadd [#allocation7], 4294967264 }
  0x30   :  { %781 = dma.done.wait [#allocation10], 32  }
  0x31   :  { %782 = vsyncadd [#allocation10], 4294967264  ;;  %s861_s21 = smov 0  }
  0x32 LB: > { %s867_s22 = sshll.u32 %s789_s21, 3  ;;  %s789_s21 = sphi %s861_s21, %s48_s21  }
  0x33   : > { %s51_s3 = sld [smem:[#allocation5 + %s867_s22]]  ;;  %s62_s23 = sshrl.u32 %s867_s22, 3 }
  0x34   : > { %s63_s24 = sand.u32 7, %s867_s22   ;;  %s410_s25 = sshll.u32 %s62_s23, 4 }
  0x35   : > { %s65_s26 = sadd.s32 %s410_s25, %s63_s24  ;;  %s72_s27 = sadd.s32 1, %s867_s22 }
  0x36   : > { %s873_s28 = sld [smem:[#allocation5 + %s72_s27]]  ;;  %s66_s29 = scalar_lea.vmem [#allocation2], %s65_s26 }
  0x37   : > { %s68_s30 = sshll.u32 %s66_s29, 4  ;;  %s85_s5 = sshrl.u32 %s72_s27, 3  ;;  %s875_s30 = int_to_ptr.vmem [resolvable:$true] %s68_s30 }
  0x38   : > { %s86_s6 = sand.u32 7, %s72_s27   ;;  %s418_s7 = sshll.u32 %s85_s5, 4 }
  0x39   : > { %p52_p5 = scmp.gt.s32.totalorder %s51_s3, 0  ;;  %p403_p6 = scmp.lt.s32.totalorder %s51_s3, 29999 }
  0x3a   : > { %s878_s0 = sadd.s32 2, %s867_s22  ;;  %s88_s12 = sadd.s32 %s418_s7, %s86_s6 }
  0x3b   : > { %s1099_s3 = smov (!%p52_p5, %s51_s3), 0  ;;  %s89_s15 = scalar_lea.vmem [#allocation2], %s88_s12 }
  0x3c   : > { %p75_p7 = scmp.gt.s32.totalorder %s873_s28, 0  ;;  %p411_p8 = scmp.lt.s32.totalorder %s873_s28, 29999 }
  0x3d   : > { %s1101_s3 = smov (!%p403_p6, %s1099_s3), 29999  ;;  %s91_s16 = sshll.u32 %s89_s15, 4  ;;  %s888_s16 = int_to_ptr.vmem [resolvable:$true] %s91_s16 }
  0x3e   : > { %s883_s8 = scalar_select %p75_p7, %s873_s28, 0 }
  0x3f   : > { %s56_s9 = sshrl.u32 %s1101_s3, 3  ;;  %s57_s10 = sand.u32 7, %s1101_s3  }
  0x40   : > { %s408_s11 = sshll.u32 %s56_s9, 4  ;;  %s893_s24 = scalar_lea.hbm %s1094_s1, 960000 }
  0x41   : > { %s59_s13 = sadd.s32 %s408_s11, %s57_s10 }
  0x42   : > { %s409_s14 = sshll.u32 %s59_s13, 4 }
  0x43   : > { %s61_s19 = scalar_lea.hbm %s1094_s1, %s409_s14 }
  0x44   : > { %s559_s2 = scalar_lea.hbm %s61_s19, 32  ;;  %p562_p10 = scmp.lt.u32.totalorder %s61_s19, %s1094_s1 }
  0x45   : > { %p560_p9 = scmp.ne.s32.totalorder %s61_s19, %s559_s2  ;;  %p563_p11 = scmp.lt.u32.totalorder %s893_s24, %s559_s2 }
  0x46   : > { %p565_p13 = scmp.lt.u32.totalorder %s559_s2, %s61_s19 }
  0x47   : > { %p564_p12 = por %p563_p11, %p562_p10 }
  0x49   : > { %p566_p0 = por %p565_p13, %p564_p12 }
  0x4b   : > { %p567_p1 = pnand %p566_p0, %p560_p9 }
  0x4d   : > { %570 = shalt.err (!%p567_p1)  }
  0x4e   : > { %s571_s26 = scalar_lea.vmem %s875_s30, 32  ;;  %s794_s27 = smov [#allocation2]  }
  0x4f   : > { %p572_p2 = scmp.ne.s32.totalorder %s875_s30, %s571_s26  ;;  %s573_s29 = sshll.u32 %s794_s27, 4  ;;  %s901_s29 = int_to_ptr.vmem [resolvable:$false] %s573_s29 }
  0x50   : > { %s904_s5 = scalar_lea.vmem %s901_s29, 1024  ;;  %p576_p3 = scmp.lt.s32.totalorder %s875_s30, %s901_s29 }
  0x51   : > { %p577_p4 = scmp.lt.s32.totalorder %s904_s5, %s571_s26 }
  0x53   : > { %p578_p5 = por %p577_p4, %p576_p3 }
  0x55   : > { %p579_p6 = pnand %p578_p5, %p572_p2 }
  0x57   : > { %582 = shalt.err (!%p579_p6)  }
  0x58   : > { %s795_s6 = smov 128   ;;  %s796_s7 = smov 1  }
  0x59   : > { %71 = dma.hbm_to_vmem [thread:$0]  %s61_s19, 32, %s875_s30, [#allocation3], %s795_s6, %s795_s6, %s796_s7 }
  0x5a   : > { %s1103_s8 = smov (!%p411_p8, %s883_s8), 29999  ;;  %s917_s9 = sld [smem:[#allocation5 + %s878_s0]] }
  0x5b   : > { %s108_s10 = sshrl.u32 %s878_s0, 3  ;;  %s79_s11 = sshrl.u32 %s1103_s8, 3 }
  0x5c   : > { %s80_s12 = sand.u32 7, %s1103_s8   ;;  %s416_s13 = sshll.u32 %s79_s11, 4 }
  0x5d   : > { %s109_s14 = sand.u32 7, %s878_s0   ;;  %s82_s15 = sadd.s32 %s416_s13, %s80_s12 }
  0x5e   : > { %s426_s17 = sshll.u32 %s108_s10, 4  ;;  %s417_s18 = sshll.u32 %s82_s15, 4 }
  0x5f   : > { %s111_s2 = sadd.s32 %s426_s17, %s109_s14  ;;  %s84_s3 = scalar_lea.hbm %s1094_s1, %s417_s18 }
  0x60   : > { %s583_s25 = scalar_lea.hbm %s84_s3, 32  ;;  %p586_p8 = scmp.lt.u32.totalorder %s84_s3, %s1094_s1 }
  0x61   : > { %p584_p7 = scmp.ne.s32.totalorder %s84_s3, %s583_s25  ;;  %p587_p9 = scmp.lt.u32.totalorder %s893_s24, %s583_s25 }
  0x62   : > { %p589_p11 = scmp.lt.u32.totalorder %s583_s25, %s84_s3 }
  0x63   : > { %p588_p10 = por %p587_p9, %p586_p8 }
  0x65   : > { %p590_p12 = por %p589_p11, %p588_p10 }
  0x67   : > { %p591_p13 = pnand %p590_p12, %p584_p7 }
  0x69   : > { %594 = shalt.err (!%p591_p13)  }
  0x6a   : > { %s595_s0 = scalar_lea.vmem %s888_s16, 32  ;;  %p600_p1 = scmp.lt.s32.totalorder %s888_s16, %s901_s29 }
  0x6b   : > { %p596_p0 = scmp.ne.s32.totalorder %s888_s16, %s595_s0  ;;  %p601_p2 = scmp.lt.s32.totalorder %s904_s5, %s595_s0 }
  0x6d   : > { %p602_p3 = por %p601_p2, %p600_p1 }
  0x6f   : > { %p603_p4 = pnand %p602_p3, %p596_p0 }
  0x71   : > { %606 = shalt.err (!%p603_p4)  }
  0x72   : > { %94 = dma.hbm_to_vmem [thread:$0]  %s84_s3, 32, %s888_s16, [#allocation3], %s795_s6, %s795_s6, %s796_s7 }
  0x73   : > { %p98_p5 = scmp.gt.s32.totalorder %s917_s9, 0  ;;  %p419_p6 = scmp.lt.s32.totalorder %s917_s9, 29999 }
  0x74   : > { %s112_s8 = scalar_lea.vmem [#allocation2], %s111_s2  ;;  %s118_s26 = sadd.s32 3, %s867_s22 }
  0x75   : > { %s114_s19 = sshll.u32 %s112_s8, 4  ;;  %s1105_s9 = smov (!%p98_p5, %s917_s9), 0  ;;  %s941_s19 = int_to_ptr.vmem [resolvable:$true] %s114_s19 }
  0x76   : > { %s943_s27 = sld [smem:[#allocation5 + %s118_s26]]  ;;  %s1107_s9 = smov (!%p419_p6, %s1105_s9), 29999 }
  0x77   : > { %s131_s10 = sshrl.u32 %s118_s26, 3  ;;  %s132_s11 = sand.u32 7, %s118_s26  }
  0x78   : > { %s102_s12 = sshrl.u32 %s1107_s9, 3  ;;  %s103_s13 = sand.u32 7, %s1107_s9  }
  0x79   : > { %s424_s14 = sshll.u32 %s102_s12, 4  ;;  %s434_s16 = sshll.u32 %s131_s10, 4 }
  0x7a   : > { %s105_s15 = sadd.s32 %s424_s14, %s103_s13  ;;  %s134_s17 = sadd.s32 %s434_s16, %s132_s11 }
  0x7b   : > { %s425_s18 = sshll.u32 %s105_s15, 4 }
  0x7c   : > { %p121_p7 = scmp.gt.s32.totalorder %s943_s27, 0  ;;  %s107_s23 = scalar_lea.hbm %s1094_s1, %s425_s18 }
  0x7d   : > { %p427_p8 = scmp.lt.s32.totalorder %s943_s27, 29999  ;;  %s607_s3 = scalar_lea.hbm %s107_s23, 32 }
  0x7e   : > { %p608_p9 = scmp.ne.s32.totalorder %s107_s23, %s607_s3  ;;  %p610_p10 = scmp.lt.u32.totalorder %s107_s23, %s1094_s1 }
  0x7f   : > { %p611_p11 = scmp.lt.u32.totalorder %s893_s24, %s607_s3  ;;  %p613_p13 = scmp.lt.u32.totalorder %s607_s3, %s107_s23 }
  0x81   : > { %p612_p12 = por %p611_p11, %p610_p10 }
  0x83   : > { %p614_p0 = por %p613_p13, %p612_p12 }
  0x85   : > { %p615_p1 = pnand %p614_p0, %p608_p9 }
  0x87   : > { %618 = shalt.err (!%p615_p1)  }
  0x88   : > { %s619_s9 = scalar_lea.vmem %s941_s19, 32  ;;  %p624_p3 = scmp.lt.s32.totalorder %s941_s19, %s901_s29 }
  0x89   : > { %p620_p2 = scmp.ne.s32.totalorder %s941_s19, %s619_s9  ;;  %p625_p4 = scmp.lt.s32.totalorder %s904_s5, %s619_s9 }
  0x8b   : > { %p626_p5 = por %p625_p4, %p624_p3 }
  0x8d   : > { %p627_p6 = pnand %p626_p5, %p620_p2 }
  0x8f   : > { %630 = shalt.err (!%p627_p6)  }
  0x90   : > { %117 = dma.hbm_to_vmem [thread:$0]  %s107_s23, 32, %s941_s19, [#allocation3], %s795_s6, %s795_s6, %s796_s7 }
  0x91   : > { %s122_s30 = scalar_select %p121_p7, %s943_s27, 0 }
  0x92   : > { %s967_s0 = sadd.s32 4, %s867_s22  ;;  %s135_s8 = scalar_lea.vmem [#allocation2], %s134_s17 }
  0x93   : > { %s1109_s30 = smov (!%p427_p8, %s122_s30), 29999  ;;  %s137_s26 = sshll.u32 %s135_s8, 4  ;;  %s138_s26 = int_to_ptr.vmem [resolvable:$true] %s137_s26 }
  0x94   : > { %s972_s10 = sld [smem:[#allocation5 + %s967_s0]]  ;;  %s125_s11 = sshrl.u32 %s1109_s30, 3 }
  0x95   : > { %s126_s12 = sand.u32 7, %s1109_s30   ;;  %s432_s13 = sshll.u32 %s125_s11, 4 }
  0x96   : > { %s128_s14 = sadd.s32 %s432_s13, %s126_s12  ;;  %s154_s19 = sshrl.u32 %s967_s0, 3 }
  0x97   : > { %s433_s16 = sshll.u32 %s128_s14, 4  ;;  %s155_s15 = sand.u32 7, %s967_s0  }
  0x98   : > { %s130_s27 = scalar_lea.hbm %s1094_s1, %s433_s16  ;;  %s442_s20 = sshll.u32 %s154_s19, 4 }
  0x99   : > { %s631_s23 = scalar_lea.hbm %s130_s27, 32  ;;  %p634_p8 = scmp.lt.u32.totalorder %s130_s27, %s1094_s1 }
  0x9a   : > { %p632_p7 = scmp.ne.s32.totalorder %s130_s27, %s631_s23  ;;  %p635_p9 = scmp.lt.u32.totalorder %s893_s24, %s631_s23 }
  0x9b   : > { %p637_p11 = scmp.lt.u32.totalorder %s631_s23, %s130_s27 }
  0x9c   : > { %p636_p10 = por %p635_p9, %p634_p8 }
  0x9e   : > { %p638_p12 = por %p637_p11, %p636_p10 }
  0xa0   : > { %p639_p13 = pnand %p638_p12, %p632_p7 }
  0xa2   : > { %642 = shalt.err (!%p639_p13)  }
  0xa3   : > { %s643_s25 = scalar_lea.vmem %s138_s26, 32  ;;  %p648_p1 = scmp.lt.s32.totalorder %s138_s26, %s901_s29 }
  0xa4   : > { %p644_p0 = scmp.ne.s32.totalorder %s138_s26, %s643_s25  ;;  %p649_p2 = scmp.lt.s32.totalorder %s904_s5, %s643_s25 }
  0xa6   : > { %p650_p3 = por %p649_p2, %p648_p1 }
  0xa8   : > { %p651_p4 = pnand %p650_p3, %p644_p0 }
  0xaa   : > { %654 = shalt.err (!%p651_p4)  }
  0xab   : > { %140 = dma.hbm_to_vmem [thread:$0]  %s130_s27, 32, %s138_s26, [#allocation3], %s795_s6, %s795_s6, %s796_s7 }
  0xac   : > { %p144_p5 = scmp.gt.s32.totalorder %s972_s10, 0  ;;  %p435_p6 = scmp.lt.s32.totalorder %s972_s10, 29999 }
  0xad   : > { %s157_s28 = sadd.s32 %s442_s20, %s155_s15  ;;  %s991_s9 = sadd.s32 5, %s867_s22 }
  0xae   : > { %s1111_s10 = smov (!%p144_p5, %s972_s10), 0  ;;  %s995_s30 = sld [smem:[#allocation5 + %s991_s9]] }
  0xaf   : > { %s1113_s10 = smov (!%p435_p6, %s1111_s10), 29999  ;;  %s158_s0 = scalar_lea.vmem [#allocation2], %s157_s28 }
  0xb0   : > { %s160_s8 = sshll.u32 %s158_s0, 4  ;;  %s177_s11 = sshrl.u32 %s991_s9, 3  ;;  %s161_s8 = int_to_ptr.vmem [resolvable:$true] %s160_s8 }
  0xb1   : > { %s148_s12 = sshrl.u32 %s1113_s10, 3  ;;  %s149_s26 = sand.u32 7, %s1113_s10  }
  0xb2   : > { %s440_s13 = sshll.u32 %s148_s12, 4  ;;  %s178_s19 = sand.u32 7, %s991_s9  }
  0xb3   : > { %s151_s14 = sadd.s32 %s440_s13, %s149_s26 }
  0xb4   : > { %s441_s16 = sshll.u32 %s151_s14, 4  ;;  %p167_p7 = scmp.gt.s32.totalorder %s995_s30, 0 }
  0xb5   : > { %s153_s2 = scalar_lea.hbm %s1094_s1, %s441_s16  ;;  %p443_p8 = scmp.lt.s32.totalorder %s995_s30, 29999 }
  0xb6   : > { %s655_s27 = scalar_lea.hbm %s153_s2, 32  ;;  %p658_p10 = scmp.lt.u32.totalorder %s153_s2, %s1094_s1 }
  0xb7   : > { %p656_p9 = scmp.ne.s32.totalorder %s153_s2, %s655_s27  ;;  %p659_p11 = scmp.lt.u32.totalorder %s893_s24, %s655_s27 }
  0xb8   : > { %p661_p13 = scmp.lt.u32.totalorder %s655_s27, %s153_s2 }
  0xb9   : > { %p660_p12 = por %p659_p11, %p658_p10 }
  0xbb   : > { %p662_p0 = por %p661_p13, %p660_p12 }
  0xbd   : > { %p663_p1 = pnand %p662_p0, %p656_p9 }
  0xbf   : > { %666 = shalt.err (!%p663_p1)  }
  0xc0   : > { %s667_s10 = scalar_lea.vmem %s161_s8, 32  ;;  %p672_p3 = scmp.lt.s32.totalorder %s161_s8, %s901_s29 }
  0xc1   : > { %p668_p2 = scmp.ne.s32.totalorder %s161_s8, %s667_s10  ;;  %p673_p4 = scmp.lt.s32.totalorder %s904_s5, %s667_s10 }
  0xc3   : > { %p674_p5 = por %p673_p4, %p672_p3 }
  0xc5   : > { %p675_p6 = pnand %p674_p5, %p668_p2 }
  0xc7   : > { %678 = shalt.err (!%p675_p6)  }
  0xc8   : > { %163 = dma.hbm_to_vmem [thread:$0]  %s153_s2, 32, %s161_s8, [#allocation3], %s795_s6, %s795_s6, %s796_s7 }
  0xc9   : > { %s168_s17 = scalar_select %p167_p7, %s995_s30, 0 }
  0xca   : > { %s450_s3 = sshll.u32 %s177_s11, 4  ;;  %s1019_s25 = sadd.s32 6, %s867_s22 }
  0xcb   : > { %s1115_s17 = smov (!%p443_p8, %s168_s17), 29999  ;;  %s180_s28 = sadd.s32 %s450_s3, %s178_s19 }
  0xcc   : > { %s1024_s0 = sld [smem:[#allocation5 + %s1019_s25]]  ;;  %s171_s12 = sshrl.u32 %s1115_s17, 3 }
  0xcd   : > { %s172_s26 = sand.u32 7, %s1115_s17   ;;  %s448_s13 = sshll.u32 %s171_s12, 4 }
  0xce   : > { %s174_s14 = sadd.s32 %s448_s13, %s172_s26  ;;  %s181_s16 = scalar_lea.vmem [#allocation2], %s180_s28 }
  0xcf   : > { %s183_s8 = sshll.u32 %s181_s16, 4  ;;  %s449_s15 = sshll.u32 %s174_s14, 4  ;;  %s184_s8 = int_to_ptr.vmem [resolvable:$true] %s183_s8 }
  0xd0   : > { %s176_s18 = scalar_lea.hbm %s1094_s1, %s449_s15  ;;  %s200_s30 = sshrl.u32 %s1019_s25, 3 }
  0xd1   : > { %s679_s2 = scalar_lea.hbm %s176_s18, 32  ;;  %p682_p8 = scmp.lt.u32.totalorder %s176_s18, %s1094_s1 }
  0xd2   : > { %p680_p7 = scmp.ne.s32.totalorder %s176_s18, %s679_s2  ;;  %p683_p9 = scmp.lt.u32.totalorder %s893_s24, %s679_s2 }
  0xd3   : > { %p685_p11 = scmp.lt.u32.totalorder %s679_s2, %s176_s18 }
  0xd4   : > { %p684_p10 = por %p683_p9, %p682_p8 }
  0xd6   : > { %p686_p12 = por %p685_p11, %p684_p10 }
  0xd8   : > { %p687_p13 = pnand %p686_p12, %p680_p7 }
  0xda   : > { %690 = shalt.err (!%p687_p13)  }
  0xdb   : > { %s691_s19 = scalar_lea.vmem %s184_s8, 32  ;;  %p696_p1 = scmp.lt.s32.totalorder %s184_s8, %s901_s29 }
  0xdc   : > { %p692_p0 = scmp.ne.s32.totalorder %s184_s8, %s691_s19  ;;  %p697_p2 = scmp.lt.s32.totalorder %s904_s5, %s691_s19 }
  0xde   : > { %p698_p3 = por %p697_p2, %p696_p1 }
  0xe0   : > { %p699_p4 = pnand %p698_p3, %p692_p0 }
  0xe2   : > { %702 = shalt.err (!%p699_p4)  }
  0xe3   : > { %186 = dma.hbm_to_vmem [thread:$0]  %s176_s18, 32, %s184_s8, [#allocation3], %s795_s6, %s795_s6, %s796_s7 }
  0xe4   : > { %p190_p5 = scmp.gt.s32.totalorder %s1024_s0, 0  ;;  %p451_p6 = scmp.lt.s32.totalorder %s1024_s0, 29999 }
  0xe5   : > { %s201_s23 = sand.u32 7, %s1019_s25   ;;  %s458_s10 = sshll.u32 %s200_s30, 4 }
  0xe6   : > { %s1117_s0 = smov (!%p190_p5, %s1024_s0), 0  ;;  %s203_s17 = sadd.s32 %s458_s10, %s201_s23 }
  0xe7   : > { %s1044_s3 = sadd.s32 7, %s867_s22  ;;  %s1119_s0 = smov (!%p451_p6, %s1117_s0), 29999 }
  0xe8   : > { %s1047_s28 = sld [smem:[#allocation5 + %s1044_s3]]  ;;  %s194_s12 = sshrl.u32 %s1119_s0, 3 }
  0xe9   : > { %s195_s26 = sand.u32 7, %s1119_s0   ;;  %s456_s13 = sshll.u32 %s194_s12, 4 }
  0xea   : > { %s204_s14 = scalar_lea.vmem [#allocation2], %s203_s17  ;;  %s197_s8 = sadd.s32 %s456_s13, %s195_s26 }
  0xeb   : > { %s206_s16 = sshll.u32 %s204_s14, 4  ;;  %s457_s25 = sshll.u32 %s197_s8, 4  ;;  %s207_s16 = int_to_ptr.vmem [resolvable:$true] %s206_s16 }
  0xec   : > { %s223_s15 = sshrl.u32 %s1044_s3, 3  ;;  %s199_s22 = scalar_lea.hbm %s1094_s1, %s457_s25 }
  0xed   : > { %s224_s18 = sand.u32 7, %s1044_s3   ;;  %s703_s30 = scalar_lea.hbm %s199_s22, 32 }
  0xee   : > { %p704_p7 = scmp.ne.s32.totalorder %s199_s22, %s703_s30  ;;  %p706_p8 = scmp.lt.u32.totalorder %s199_s22, %s1094_s1 }
  0xef   : > { %p707_p9 = scmp.lt.u32.totalorder %s893_s24, %s703_s30  ;;  %p709_p11 = scmp.lt.u32.totalorder %s703_s30, %s199_s22 }
  0xf1   : > { %p708_p10 = por %p707_p9, %p706_p8 }
  0xf3   : > { %p710_p12 = por %p709_p11, %p708_p10 }
  0xf5   : > { %p711_p13 = pnand %p710_p12, %p704_p7 }
  0xf7   : > { %714 = shalt.err (!%p711_p13)  }
  0xf8   : > { %s715_s0 = scalar_lea.vmem %s207_s16, 32  ;;  %p720_p1 = scmp.lt.s32.totalorder %s207_s16, %s901_s29 }
  0xf9   : > { %p716_p0 = scmp.ne.s32.totalorder %s207_s16, %s715_s0  ;;  %p721_p2 = scmp.lt.s32.totalorder %s904_s5, %s715_s0 }
  0xfb   : > { %p722_p3 = por %p721_p2, %p720_p1 }
  0xfd   : > { %p723_p4 = pnand %p722_p3, %p716_p0 }
  0xff   : > { %726 = shalt.err (!%p723_p4)  }
 0x100   : > { %209 = dma.hbm_to_vmem [thread:$0]  %s199_s22, 32, %s207_s16, [#allocation3], %s795_s6, %s795_s6, %s796_s7 }
 0x101   : > { %p213_p5 = scmp.gt.s32.totalorder %s1047_s28, 0  ;;  %p459_p6 = scmp.lt.s32.totalorder %s1047_s28, 29999 }
 0x102   : > { %s466_s20 = sshll.u32 %s223_s15, 4 }
 0x103   : > { %s1121_s28 = smov (!%p213_p5, %s1047_s28), 0  ;;  %s226_s19 = sadd.s32 %s466_s20, %s224_s18 }
 0x104   : > { %s1123_s28 = smov (!%p459_p6, %s1121_s28), 29999  ;;  %s227_s3 = scalar_lea.vmem [#allocation2], %s226_s19 }
 0x105   : > { %s217_s23 = sshrl.u32 %s1123_s28, 3  ;;  %s218_s10 = sand.u32 7, %s1123_s28  }
 0x106   : > { %s464_s17 = sshll.u32 %s217_s23, 4  ;;  %s229_s12 = sshll.u32 %s227_s3, 4  ;;  %s230_s12 = int_to_ptr.vmem [resolvable:$true] %s229_s12 }
 0x107   : > { %s220_s26 = sadd.s32 %s464_s17, %s218_s10 }
 0x108   : > { %s465_s13 = sshll.u32 %s220_s26, 4 }
 0x109   : > { %s222_s25 = scalar_lea.hbm %s1094_s1, %s465_s13 }
 0x10a   : > { %s727_s16 = scalar_lea.hbm %s222_s25, 32  ;;  %p730_p8 = scmp.lt.u32.totalorder %s222_s25, %s1094_s1 }
 0x10b   : > { %p728_p7 = scmp.ne.s32.totalorder %s222_s25, %s727_s16  ;;  %p731_p9 = scmp.lt.u32.totalorder %s893_s24, %s727_s16 }
 0x10c   : > { %p733_p11 = scmp.lt.u32.totalorder %s727_s16, %s222_s25 }
 0x10d   : > { %p732_p10 = por %p731_p9, %p730_p8 }
 0x10f   : > { %p734_p12 = por %p733_p11, %p732_p10 }
 0x111   : > { %p735_p13 = pnand %p734_p12, %p728_p7 }
 0x113   : > { %738 = shalt.err (!%p735_p13)  }
 0x114   : > { %s739_s28 = scalar_lea.vmem %s230_s12, 32  ;;  %p744_p1 = scmp.lt.s32.totalorder %s230_s12, %s901_s29 }
 0x115   : > { %p740_p0 = scmp.ne.s32.totalorder %s230_s12, %s739_s28  ;;  %p745_p2 = scmp.lt.s32.totalorder %s904_s5, %s739_s28 }
 0x117   : > { %p746_p3 = por %p745_p2, %p744_p1 }
 0x119   : > { %p747_p4 = pnand %p746_p3, %p740_p0 }
 0x11b   : > { %750 = shalt.err (!%p747_p4)  }
 0x11c   : > { %232 = dma.hbm_to_vmem [thread:$0]  %s222_s25, 32, %s230_s12, [#allocation3], %s795_s6, %s795_s6, %s796_s7 }
 0x11d   : > { %s48_s21 = sadd.s32 1, %s789_s21  }
 0x11e   : > { %p45_p5 = scmp.ge.s32.totalorder %s48_s21, 2  }
 0x120   :  { %47 = sbr.rel (!%p45_p5) target bundleno = 50 (0x32), region = 60 }
 0x127   :  { %783 = dma.done.wait [#allocation3], 512 }
 0x128   :  { %784 = vsyncadd [#allocation3], 4294966784  ;;  %v237_v0 = vld [vmem:[#allocation2] sm:$0xff]  ;;  %v238_v1 = vld [vmem:[#allocation2 + $0x8] sm:$0xff]  ;;  %v276_v22 = vlaneseq  ;;  %s797_s1 = smov [#allocation11]  }
 0x129   :  { %v239_v2 = vld [vmem:[#allocation2 + $0x10] sm:$0xff]  ;;  %v241_v3 = vadd.f32 %v238_v1, %v237_v0  ;;  %v240_v4 = vld [vmem:[#allocation2 + $0x18] sm:$0xff]  ;;  %v274_v30 = vld [vmem:[#allocation6] sm:$0x3]  ;;  %s315_s21 = sshll.u32 %s797_s1, 4  ;;  %s316_s21 = int_to_ptr.vmem [resolvable:$true] %s315_s21 }
 0x12a   :  { %v244_v5 = vadd.f32 %v240_v4, %v239_v2  ;;  %v277_v26 = vshrl.u32 %v276_v22, 7  ;;  %v290_v31 = vld [vmem:[#allocation9] sm:$0x3]  ;;  %s751_s24 = scalar_lea.vmem %s316_s21, 512  ;;  %p756_p7 = scmp.lt.s32.totalorder %s316_s21, %s316_s21 }
 0x12b   :  { %242 = vadd.xlane.f32.xlu0 %v241_v3  ;;  %p752_p6 = scmp.ne.s32.totalorder %s316_s21, %s751_s24  ;;  %p757_p8 = scmp.lt.s32.totalorder %s751_s24, %s751_s24 }
 0x12c   :  { %v278_v28 = vsub.s32 0, %v277_v26  ;;  %v282_v29 = vsub.s32 1, %v277_v26 }
 0x12d   :  { %p758_p9 = por %p757_p8, %p756_p7 }
 0x12e   :  { %v279_v32 = vrot.slane %v274_v30, %v278_v28  ;;  %v283_v33 = vrot.slane %v274_v30, %v282_v29  ;;  %v295_v35 = vrot.slane %v290_v31, %v278_v28  ;;  %v299_v36 = vrot.slane %v290_v31, %v282_v29 }
 0x12f   :  { %245 = vadd.xlane.f32.xlu0 %v244_v5  ;;  %p759_p10 = pnand %p758_p9, %p752_p6 }
 0x1b8   :  { %v243_v6 = vpop.xlane.xlu0 %242 }
 0x1b9   :  { %v248_v7 = vmul.f32 0.00390625, %v243_v6 }
 0x1bb   :  { %v250_v8 = vsub.f32 %v237_v0, %v248_v7  ;;  %v251_v9 = vsub.f32 %v238_v1, %v248_v7 }
 0x1bc   :  { %v246_v10 = vpop.xlane.xlu0 %245 }
 0x1bd   :  { %v249_v11 = vmul.f32 0.00390625, %v246_v10  ;;  %v254_v12 = vmul.f32 %v250_v8, %v250_v8  ;;  %v255_v13 = vmul.f32 %v251_v9, %v251_v9 }
 0x1bf   :  { %v252_v14 = vsub.f32 %v239_v2, %v249_v11  ;;  %v253_v15 = vsub.f32 %v240_v4, %v249_v11  ;;  %v258_v16 = vadd.f32 %v255_v13, %v254_v12 }
 0x1c1   :  { %259 = vadd.xlane.f32.xlu1 %v258_v16  ;;  %v256_v17 = vmul.f32 %v252_v14, %v252_v14  ;;  %v257_v18 = vmul.f32 %v253_v15, %v253_v15 }
 0x1c3   :  { %v261_v19 = vadd.f32 %v257_v18, %v256_v17 }
 0x1c5   :  { %262 = vadd.xlane.f32.xlu1 %v261_v19 }
 0x24e   :  { %v260_v20 = vpop.xlane.xlu1 %259 }
 0x24f   :  { %v264_v21 = vmul.f32 0.00390625, %v260_v20 }
 0x251   :  { %v266_v23 = vadd.f32 1e-05, %v264_v21 }
 0x252   :  { %v263_v24 = vpop.xlane.xlu1 %262 }
 0x253   :  { %501 = vrsqrt.f32 %v266_v23  ;;  %v265_v25 = vmul.f32 0.00390625, %v263_v24 }
 0x255   :  { %v267_v27 = vadd.f32 1e-05, %v265_v25 }
 0x257   :  { %503 = vrsqrt.f32 %v267_v27 }
 0x25d   :  { %v502_v34 = vpop.eup %501 }
 0x25e   :  { %v270_v37 = vmul.f32 %v502_v34, %v250_v8  ;;  %v271_v38 = vmul.f32 %v502_v34, %v251_v9 }
 0x260   :  { %v286_v39 = vmul.f32 %v279_v32, %v270_v37  ;;  %v287_v40 = vmul.f32 %v283_v33, %v271_v38 }
 0x261   :  { %v504_v41 = vpop.eup %503 }
 0x262   :  { %v302_v42 = vadd.f32 %v295_v35, %v286_v39  ;;  %v303_v43 = vadd.f32 %v299_v36, %v287_v40  ;;  %v272_v44 = vmul.f32 %v504_v41, %v252_v14  ;;  %v273_v45 = vmul.f32 %v504_v41, %v253_v15 }
 0x264   :  { %306 = vst [vmem:[#allocation11] sm:$0xff] %v302_v42  ;;  %307 = vst [vmem:[#allocation11 + $0x8] sm:$0xff] %v303_v43  ;;  %v288_v46 = vmul.f32 %v279_v32, %v272_v44  ;;  %v289_v47 = vmul.f32 %v283_v33, %v273_v45 }
 0x266   :  { %v304_v48 = vadd.f32 %v295_v35, %v288_v46  ;;  %v305_v49 = vadd.f32 %v299_v36, %v289_v47 }
 0x268   :  { %308 = vst [vmem:[#allocation11 + $0x10] sm:$0xff] %v304_v48  ;;  %309 = vst [vmem:[#allocation11 + $0x18] sm:$0xff] %v305_v49 }
 0x269   :  { %762 = shalt.err (!%p759_p10)
}
 0x26a   :  { %s763_s6 = scalar_lea.hbm %s1097_s4, 512 }
 0x26b   :  { %p764_p11 = scmp.ne.s32.totalorder %s1097_s4, %s763_s6  ;;  %p767_p12 = scmp.lt.u32.totalorder %s763_s6, %s1097_s4 }
 0x26d   :  { %p769_p13 = pnand %p767_p12, %p764_p11 }
 0x26f   :  { %772 = shalt.err (!%p769_p13)
}
 0x270   :  { %s798_s30 = smov 256   ;;  %s799_s2 = smov 16  }
 0x271   :  { %321 = dma.vmem_to_hbm [thread:$0]  %s316_s21, 512, %s1097_s4, [#allocation8], %s798_s30, %s798_s30, %s799_s2  }
 0x272   :  { %785 = dma.done.wait [#allocation8], 512  }
 0x273   :  { %786 = vsyncadd [#allocation8], 4294966784 }
 0x274   :  { %325 = vsyncpa [#allocation7], 1 }
 0x275   :  { %326 = vsyncpa [#allocation10], 1 }
 0x276   :  { %327 = vsyncpa [#allocation8], 1 }
 0x277   :  { %328 = vsyncmov [#allocation3] }
 0x27a   :  { %s329_s20 = vpop.sfrf %328 }
 0x27b   :  { %p467_p0 = scmp.ne.s32.totalorder %s329_s20, 0 }
 0x27d   :  { %333 = shalt.err (%p467_p0)  }
 0x27e   :  { %335 = vsyncmov [#allocation3 + $0x1] }
 0x281   :  { %s336_s19 = vpop.sfrf %335 }
 0x282   :  { %p468_p1 = scmp.ne.s32.totalorder %s336_s19, 0 }
 0x284   :  { %340 = shalt.err (%p468_p1)  }

</bundles_post_ra>
